<compile_context>
chip_gen: v6e
topology: v6e:2x2x1
jax: 0.10.0
libtpu: 0.0.40
codegen_flags: <defaults>
</compile_context>

<pallas_src>
import functools
import math

import jax
import jax.numpy as jnp
from jax.experimental import pallas as pl
from jax.experimental.pallas import tpu as pltpu

NUM_CHANNELS = 1
N_CLASSES = 9
_BN_EPS = 1e-5


def _round_up(v, m):
    return ((v + m - 1) // m) * m


def _device_config():
    """(TM, TN, vmem_limit_bytes) per TPU generation."""
    try:
        kind = jax.devices()[0].device_kind.lower()
    except Exception:
        kind = ""
    if any(t in kind for t in ("v4", "v5", "v6")):
        vmem = 96 * 1024 * 1024          # 128 MiB VMEM parts
    else:
        vmem = 56 * 1024 * 1024          # v7x: 64 MiB physical VMEM
    return 256, 256, vmem


_TM, _TN, _VMEM = _device_config()


def _choose_tm(M, cap):
    """M tile: multiple of 16 (bf16 packing); split so >=2 M blocks when possible (v7x)."""
    tm = min(cap, _round_up(M, 16))
    if M > 32 and -(-M // tm) < 2:
        tm = min(cap, max(16, _round_up(-(-M // 2), 16)))
    return tm


def _resident_fits(Kp, Np, tm, tk):
    """Conservative VMEM estimate (assumes double-buffering) for the weight-resident path."""
    need = (2 * Kp * Np * 2          # resident weight (bf16, 2 buffers)
            + 2 * tm * tk * 2        # x blocks
            + 2 * tm * Np * 4        # output blocks (worst case f32)
            + tm * Np * 4            # f32 accumulator scratch
            + 4 * Np * 4)            # scale + bias
    return need <= int(0.85 * _VMEM)


# ----------------------------- Pallas kernels -----------------------------

def _mm_resident_kernel(x_ref, w_ref, s_ref, b_ref, o_ref, acc_ref, *, relu):
    """Weight-resident matmul: w_ref is the full (Kp, Np) weight kept in VMEM; x streams
    (tm, tk) blocks over grid (m, k); fused scale/bias (+ReLU) epilogue in f32."""
    k = pl.program_id(1)
    tk = x_ref.shape[1]

    @pl.when(k == 0)
    def _():
        acc_ref[...] = jnp.zeros_like(acc_ref)

    off = pl.multiple_of(k * tk, tk)
    acc_ref[...] += jnp.dot(x_ref[...], w_ref[pl.ds(off, tk), :],
                            preferred_element_type=jnp.float32)

    @pl.when(k == pl.num_programs(1) - 1)
    def _():
        y = acc_ref[...] * s_ref[...] + b_ref[...]
        if relu:
            y = jnp.maximum(y, 0.0)
        o_ref[...] = y.astype(o_ref.dtype)


def _mm_streamed_kernel(x_ref, w_ref, s_ref, b_ref, o_ref, acc_ref, *, relu):
    """Fallback (m, n, k)-tiled matmul for weights too large to keep resident."""
    k = pl.program_id(2)

    @pl.when(k == 0)
    def _():
        acc_ref[...] = jnp.zeros_like(acc_ref)

    acc_ref[...] += jnp.dot(x_ref[...], w_ref[...],
                            preferred_element_type=jnp.float32)

    @pl.when(k == pl.num_programs(2) - 1)
    def _():
        y = acc_ref[...] * s_ref[...] + b_ref[...]
        if relu:
            y = jnp.maximum(y, 0.0)
        o_ref[...] = y.astype(o_ref.dtype)


def _dw_kernel(p_ref, w_ref, o_ref):
    """Depthwise 3x3: p_ref (tm, 9*C) bf16 patches, w_ref (1, 9*C) f32 per-channel taps.
    Taps are lane-contiguous, 128-aligned slices -> pure VPU multiply-add."""
    C = o_ref.shape[1]
    w = w_ref[...].astype(jnp.float32)
    acc = p_ref[:, 0:C].astype(jnp.float32) * w[:, 0:C]
    for t in range(1, 9):
        acc = acc + (p_ref[:, t * C:(t + 1) * C].astype(jnp.float32)
                     * w[:, t * C:(t + 1) * C])
    o_ref[...] = acc.astype(o_ref.dtype)


# ----------------------------- matmul wrapper -----------------------------

def matmul_scale_bias(x, w, scale, bias, *, relu, out_dtype):
    """out = maybe_relu((x @ w) * scale + bias)

    x: (M, K) activation (cast to bf16 here); w: (Kp, Np) pre-padded bf16 weight
    (Np multiple of 128; Kp == K except for the stem conv where K=9 is padded to 16);
    scale/bias: (1, Np) f32 with zeros in the padded region.  Output is (M, Np) -> the
    channel padding is carried through to the next layer (lane-dense stores, no masks).
    """
    M, K = x.shape
    Kp, Np = w.shape
    x = x.astype(jnp.bfloat16)

    tm = _choose_tm(M, _TM)
    Mp = tm if M < tm else M
    pad_m = Mp - M
    pad_k = Kp - K
    if pad_m or pad_k:
        x = jnp.pad(x, ((0, pad_m), (0, pad_k)))
    grid_m = -(-Mp // tm)

    if Kp % 128:
        tk = Kp                                       # stem conv: K == full dim
    else:
        tk = next(c for c in (512, 384, 256, 128) if Kp % c == 0)

    if _resident_fits(Kp, Np, tm, tk):
        out = pl.pallas_call(
            functools.partial(_mm_resident_kernel, relu=relu),
            out_shape=jax.ShapeDtypeStruct((Mp, Np), out_dtype),
            grid_spec=pltpu.PrefetchScalarGridSpec(
                num_scalar_prefetch=0,
                grid=(grid_m, Kp // tk),
                in_specs=[
                    pl.BlockSpec((tm, tk), lambda m, k: (m, k)),
                    pl.BlockSpec((Kp, Np), lambda m, k: (0, 0)),   # resident weight
                    pl.BlockSpec((1, Np), lambda m, k: (0, 0)),
                    pl.BlockSpec((1, Np), lambda m, k: (0, 0)),
                ],
                out_specs=pl.BlockSpec((tm, Np), lambda m, k: (m, 0)),
                scratch_shapes=[pltpu.VMEM((tm, Np), jnp.float32)],
            ),
            compiler_params=pltpu.CompilerParams(
                dimension_semantics=("parallel", "arbitrary"),
                vmem_limit_bytes=_VMEM),
        )(x, w, scale, bias)
    else:
        tn = _TN if Np % _TN == 0 else 128
        out = pl.pallas_call(
            functools.partial(_mm_streamed_kernel, relu=relu),
            out_shape=jax.ShapeDtypeStruct((Mp, Np), out_dtype),
            grid_spec=pltpu.PrefetchScalarGridSpec(
                num_scalar_prefetch=0,
                grid=(grid_m, Np // tn, Kp // tk),
                in_specs=[
                    pl.BlockSpec((tm, tk), lambda m, n, k: (m, k)),
                    pl.BlockSpec((tk, tn), lambda m, n, k: (k, n)),
                    pl.BlockSpec((1, tn), lambda m, n, k: (0, n)),
                    pl.BlockSpec((1, tn), lambda m, n, k: (0, n)),
                ],
                out_specs=pl.BlockSpec((tm, tn), lambda m, n, k: (m, n)),
                scratch_shapes=[pltpu.VMEM((tm, tn), jnp.float32)],
            ),
            compiler_params=pltpu.CompilerParams(
                dimension_semantics=("parallel", "parallel", "arbitrary"),
                vmem_limit_bytes=_VMEM),
        )(x, w, scale, bias)

    if pad_m:
        out = out[:M]
    return out


# ----------------------------- im2col glue -----------------------------

def extract_patches3x3(x_nhwc, stride):
    """(N, OH, OW, 9, C) patches (same dtype as x) for a 3x3, padding=1 conv."""
    N, H, W, C = x_nhwc.shape
    OH = (H + 2 - 3) // stride + 1
    OW = (W + 2 - 3) // stride + 1
    xp = jnp.pad(x_nhwc, ((0, 0), (1, 1), (1, 1), (0, 0)))
    cols = []
    for dy in range(3):
        for dx in range(3):
            cols.append(xp[:, dy:dy + stride * OH:stride,
                           dx:dx + stride * OW:stride, :])
    return jnp.stack(cols, axis=3), OH, OW


def conv3x3_bn_relu(x, layer):
    N, H, W, C = x.shape
    p, OH, OW = extract_patches3x3(x, layer["stride"])
    pm = p.reshape(N * OH * OW, 9 * C)
    y = matmul_scale_bias(pm, layer["w"], layer["scale"], layer["bias"],
                          relu=True, out_dtype=jnp.bfloat16)
    return y.reshape(N, OH, OW, layer["w"].shape[1])


def depthwise3x3(x, w_flat):
    """3x3 depthwise conv, stride 1, pad 1.  x: (N,H,W,C) bf16, w_flat: (1, 9*C) f32."""
    N, H, W, C = x.shape
    p, OH, OW = extract_patches3x3(x, 1)
    M = N * OH * OW
    pm = p.reshape(M, 9 * C)
    tm = _choose_tm(M, 128)
    Mp = tm if M < tm else M
    if Mp != M:
        pm = jnp.pad(pm, ((0, Mp - M), (0, 0)))
    grid_m = -(-Mp // tm)
    out = pl.pallas_call(
        _dw_kernel,
        out_shape=jax.ShapeDtypeStruct((Mp, C), jnp.bfloat16),
        grid_spec=pltpu.PrefetchScalarGridSpec(
            num_scalar_prefetch=0,
            grid=(grid_m,),
            in_specs=[
                pl.BlockSpec((tm, 9 * C), lambda m: (m, 0)),
                pl.BlockSpec((1, 9 * C), lambda m: (0, 0)),
            ],
            out_specs=pl.BlockSpec((tm, C), lambda m: (m, 0)),
        ),
        compiler_params=pltpu.CompilerParams(
            dimension_semantics=("parallel",),
            vmem_limit_bytes=_VMEM),
    )(pm, w_flat)
    if Mp != M:
        out = out[:M]
    return out.reshape(N, OH, OW, C)


# ----------------------------- parameters -----------------------------

_ROOT = jax.random.PRNGKey(0)
_CTR = [0]


def _nkey():
    _CTR[0] += 1
    return jax.random.fold_in(_ROOT, _CTR[0])


def _bn_fold(c):
    gamma = 1.0 + 0.1 * jax.random.uniform(_nkey(), (c,), minval=-1.0, maxval=1.0)
    beta = 0.1 * jax.random.normal(_nkey(), (c,))
    rmean = 0.1 * jax.random.normal(_nkey(), (c,))
    rvar = 1.0 + 0.1 * jax.random.uniform(_nkey(), (c,))
    scale = gamma * jax.lax.rsqrt(rvar + _BN_EPS)
    bias = beta - rmean * scale
    return scale.astype(jnp.float32), bias.astype(jnp.float32)


def _pad_nc(v, np_):
    n = v.shape[-1]
    return jnp.pad(v.reshape(1, n), ((0, 0), (0, np_ - n))).astype(jnp.float32)


def _conv_bn(cin, cin_p, cout, stride):
    """3x3 conv + folded BN.  Weight reshaped to (9*cin_p, Np) at init: input-channel
    padding (cin -> cin_p) interleaved per tap to match the carried activation padding,
    output channels padded to Np (multiple of 128).  Zero padding everywhere keeps the
    padded activation channels exactly zero after the fused scale/bias/ReLU epilogue."""
    fan_in = cin * 9
    w = jax.random.normal(_nkey(), (cout, cin, 3, 3), jnp.float32) * math.sqrt(2.0 / fan_in)
    scale, bias = _bn_fold(cout)
    Np = _round_up(cout, 128)
    K = 9 * cin_p
    Kp = K if K % 128 == 0 else _round_up(K, 16)     # stem: K=9 -> 16 (not 128)
    wt = jnp.transpose(w, (2, 3, 1, 0)).reshape(9, cin, cout)     # (tap, cin, cout)
    wt = jnp.pad(wt, ((0, 0), (0, cin_p - cin), (0, Np - cout)))
    wm = wt.reshape(K, Np)
    if Kp != K:
        wm = jnp.pad(wm, ((0, Kp - K), (0, 0)))
    return {"w": wm.astype(jnp.bfloat16),
            "scale": _pad_nc(scale, Np), "bias": _pad_nc(bias, Np),
            "stride": stride}


def _sep(cin, cout):
    """SeparableConv (depthwise 3x3 -> pointwise 1x1 -> BN) followed by the exit-flow
    BatchNorm2d: the two affines are composed (valid: no nonlinearity between them)."""
    dw = jax.random.normal(_nkey(), (cin, 1, 3, 3), jnp.float32) * math.sqrt(2.0 / 9.0)
    pw = jax.random.normal(_nkey(), (cout, cin, 1, 1), jnp.float32) * math.sqrt(2.0 / cin)
    s_a, b_a = _bn_fold(cout)        # SeparableConv.bn
    s_b, b_b = _bn_fold(cout)        # following BatchNorm2d
    scale = s_a * s_b
    bias = b_a * s_b + b_b
    Np = _round_up(cout, 128)
    pwm = jnp.pad(jnp.transpose(pw.reshape(cout, cin), (1, 0)),
                  ((0, 0), (0, Np - cout))).astype(jnp.bfloat16)         # (cin, Np)
    dwf = jnp.transpose(dw.reshape(cin, 9), (1, 0)).reshape(1, 9 * cin)  # (1, 9*cin), tap-major
    return {"dw": dwf.astype(jnp.float32), "pw": pwm,
            "scale": _pad_nc(scale, Np), "bias": _pad_nc(bias, Np)}


def make_params(num_classes=N_CLASSES):
    convs = []
    c, cp = NUM_CHANNELS, NUM_CHANNELS

    def add(cin, cin_p, cout, stride):
        convs.append(_conv_bn(cin, cin_p, cout, stride))
        return cout, _round_up(cout, 128)

    # entry flow head
    c, cp = add(c, cp, 32, 2)
    c, cp = add(c, cp, 64, 1)

    def block(c, cp, cout, nconv, stride):
        for i in range(nconv):
            c, cp = add(c, cp, cout, stride if i == 0 else 1)
        return c, cp

    c, cp = block(c, cp, 128, 2, 2)
    c, cp = block(c, cp, 256, 2, 2)
    c, cp = block(c, cp, 728, 2, 2)
    for _ in range(8):                       # middle flow
        c, cp = block(c, cp, 728, 3, 1)
    c, cp = block(c, cp, 1024, 2, 2)         # exit-flow conv block

    sep1 = _sep(1024, 1536)
    sep2 = _sep(1536, 2048)

    fc_w = jax.random.normal(_nkey(), (num_classes, 2048), jnp.float32) * math.sqrt(1.0 / 2048.0)
    fc_b = 0.01 * jax.random.normal(_nkey(), (num_classes,), jnp.float32)
    Np = _round_up(num_classes, 128)
    fc = {"w": jnp.pad(jnp.transpose(fc_w, (1, 0)),
                       ((0, 0), (0, Np - num_classes))).astype(jnp.bfloat16),
          "scale": jnp.ones((1, Np), jnp.float32),
          "bias": _pad_nc(fc_b, Np),
          "nout": num_classes}

    return {"convs": convs, "sep1": sep1, "sep2": sep2, "fc": fc}


# ----------------------------- forward -----------------------------

def xception_forward(x_nchw, params):
    # PyTorch input is NCHW f32; kernels use NHWC bf16 activations (channels padded to 128).
    x = jnp.transpose(x_nchw, (0, 2, 3, 1)).astype(jnp.bfloat16)

    # entry flow + middle flow + exit-flow conv block (Conv3x3 -> BN -> ReLU)
    for layer in params["convs"]:
        x = conv3x3_bn_relu(x, layer)

    # exit flow: (SeparableConv -> BN -> ReLU) x2, composed BN affines fused in pointwise.
    for sep in (params["sep1"], params["sep2"]):
        x = depthwise3x3(x, sep["dw"])
        N, H, W, C = x.shape
        y = matmul_scale_bias(x.reshape(N * H * W, C), sep["pw"], sep["scale"],
                              sep["bias"], relu=True, out_dtype=jnp.bfloat16)
        x = y.reshape(N, H, W, sep["pw"].shape[1])

    # AdaptiveAvgPool2d((1,1)): global spatial mean in f32 (trivial reduction glue)
    x = jnp.mean(x.astype(jnp.float32), axis=(1, 2))            # (N, 2048)

    # fc: Linear(2048, num_classes) with bias
    fc = params["fc"]
    y = matmul_scale_bias(x, fc["w"], fc["scale"], fc["bias"],
                          relu=False, out_dtype=jnp.float32)
    return y[:, :fc["nout"]]


if __name__ == "__main__":
    params = make_params()
    x = jax.random.normal(jax.random.PRNGKey(0),
                          (2, NUM_CHANNELS, 32, 32), jnp.float32)
    out = xception_forward(x, params)
    out = jax.block_until_ready(out)
    assert out.shape == (2, N_CLASSES), out.shape
    assert bool(jnp.all(jnp.isfinite(out)))
    print("KERNEL_OK")
</pallas_src>

<mosaic_0001>
module attributes {stable_mosaic.version = 11 : i64} {
  func.func @_mm_resident_kernel(%arg0: i32, %arg1: i32, %arg2: memref<256x16xbf16, #tpu.memory_space<vmem>>, %arg3: memref<16x128xbf16, #tpu.memory_space<vmem>>, %arg4: memref<1x128xf32, #tpu.memory_space<vmem>>, %arg5: memref<1x128xf32, #tpu.memory_space<vmem>>, %arg6: memref<256x128xbf16, #tpu.memory_space<vmem>>, %arg7: memref<256x128xf32, #tpu.memory_space<vmem>>) attributes {dimension_semantics = [#tpu.dimension_semantics<parallel>, #tpu.dimension_semantics<arbitrary>], iteration_bounds = array<i64: 2, 1>, scalar_prefetch = 0 : i64, scratch_operands = 1 : i64, tpu.core_type = #tpu.core_type<tc>, window_params = [{transform_indices = @transform_0, window_bounds = array<i64: 256, 16>}, {pipeline_mode = #tpu.pipeline_mode<synchronous>, transform_indices = @transform_1, window_bounds = array<i64: 16, 128>}, {pipeline_mode = #tpu.pipeline_mode<synchronous>, transform_indices = @transform_2, window_bounds = array<i64: 1, 128>}, {pipeline_mode = #tpu.pipeline_mode<synchronous>, transform_indices = @transform_3, window_bounds = array<i64: 1, 128>}, {transform_indices = @transform_4, window_bounds = array<i64: 256, 128>}]} {
    %c0_i32 = arith.constant 0 : i32
    %0 = arith.cmpi eq, %arg1, %c0_i32 : i32
    %1 = arith.extui %0 : i1 to i32
    %c0_i32_0 = arith.constant 0 : i32
    %2 = arith.cmpi ne, %1, %c0_i32_0 : i32
    scf.if %2 {
      %cst_9 = arith.constant 0.000000e+00 : f32
      %15 = vector.broadcast %cst_9 : f32 to vector<256x128xf32>
      %c0_10 = arith.constant 0 : index
      %c0_11 = arith.constant 0 : index
      %16 = vector.load %arg7[%c0_10, %c0_11] : memref<256x128xf32, #tpu.memory_space<vmem>>, vector<256x128xf32>
      tpu.vector_store %arg7[%c0_10, %c0_11], %15 {strides = array<i32>} : memref<256x128xf32, #tpu.memory_space<vmem>>, vector<256x128xf32>,
    } else {
    }
    %c16_i32 = arith.constant 16 : i32
    %3 = arith.muli %arg1, %c16_i32 : i32
    %4 = tpu.assume_multiple %3, 16 : i32
    %c0 = arith.constant 0 : index
    %c0_1 = arith.constant 0 : index
    %5 = vector.load %arg7[%c0, %c0_1] : memref<256x128xf32, #tpu.memory_space<vmem>>, vector<256x128xf32>
    %c0_2 = arith.constant 0 : index
    %c0_3 = arith.constant 0 : index
    %6 = vector.load %arg2[%c0_2, %c0_3] : memref<256x16xbf16, #tpu.memory_space<vmem>>, vector<256x16xbf16>
    %7 = arith.index_cast %4 : i32 to index
    %c0_4 = arith.constant 0 : index
    %8 = vector.load %arg3[%7, %c0_4] : memref<16x128xbf16, #tpu.memory_space<vmem>>, vector<16x128xbf16>
    %cst = arith.constant dense<0.000000e+00> : vector<256x128xf32>
    %9 = tpu.matmul %6, %8, %cst {dimension_numbers = #tpu.dot_dimension_numbers<[1], [0], [0], [1], [0, 0, 1, 1], [], []>} : vector<256x16xbf16>, vector<16x128xbf16>, vector<256x128xf32> -> vector<256x128xf32>
    %10 = arith.addf %5, %9 : vector<256x128xf32>
    %c0_5 = arith.constant 0 : index
    %c0_6 = arith.constant 0 : index
    %11 = vector.load %arg7[%c0_5, %c0_6] : memref<256x128xf32, #tpu.memory_space<vmem>>, vector<256x128xf32>
    tpu.vector_store %arg7[%c0_5, %c0_6], %10 {strides = array<i32>} : memref<256x128xf32, #tpu.memory_space<vmem>>, vector<256x128xf32>,
    %c0_i32_7 = arith.constant 0 : i32
    %12 = arith.cmpi eq, %arg1, %c0_i32_7 : i32
    %13 = arith.extui %12 : i1 to i32
    %c0_i32_8 = arith.constant 0 : i32
    %14 = arith.cmpi ne, %13, %c0_i32_8 : i32
    scf.if %14 {
      %c0_9 = arith.constant 0 : index
      %c0_10 = arith.constant 0 : index
      %15 = vector.load %arg7[%c0_9, %c0_10] : memref<256x128xf32, #tpu.memory_space<vmem>>, vector<256x128xf32>
      %c0_11 = arith.constant 0 : index
      %c0_12 = arith.constant 0 : index
      %16 = vector.load %arg4[%c0_11, %c0_12] : memref<1x128xf32, #tpu.memory_space<vmem>>, vector<1x128xf32>
      %17 = vector.broadcast %16 : vector<1x128xf32> to vector<256x128xf32>
      %18 = arith.mulf %15, %17 : vector<256x128xf32>
      %c0_13 = arith.constant 0 : index
      %c0_14 = arith.constant 0 : index
      %19 = vector.load %arg5[%c0_13, %c0_14] : memref<1x128xf32, #tpu.memory_space<vmem>>, vector<1x128xf32>
      %20 = vector.broadcast %19 : vector<1x128xf32> to vector<256x128xf32>
      %21 = arith.addf %18, %20 : vector<256x128xf32>
      %cst_15 = arith.constant 0.000000e+00 : f32
      %22 = vector.broadcast %cst_15 : f32 to vector<256x128xf32>
      %23 = arith.maximumf %21, %22 : vector<256x128xf32>
      %24 = arith.truncf %23 : vector<256x128xf32> to vector<256x128xbf16>
      %c0_16 = arith.constant 0 : index
      %c0_17 = arith.constant 0 : index
      %25 = vector.load %arg6[%c0_16, %c0_17] : memref<256x128xbf16, #tpu.memory_space<vmem>>, vector<256x128xbf16>
      tpu.vector_store %arg6[%c0_16, %c0_17], %24 {strides = array<i32>} : memref<256x128xbf16, #tpu.memory_space<vmem>>, vector<256x128xbf16>,
    } else {
    }
    return
  }
  func.func @transform_0(%arg0: i32, %arg1: i32) -> (i32, i32) {
    %c0_i32 = arith.constant 0 : i32
    return %arg0, %arg1 : i32, i32
  }
  func.func @transform_1(%arg0: i32, %arg1: i32) -> (i32, i32) {
    %c0_i32 = arith.constant 0 : i32
    %c0_i32_0 = arith.constant 0 : i32
    %c0_i32_1 = arith.constant 0 : i32
    return %c0_i32, %c0_i32_0 : i32, i32
  }
  func.func @transform_2(%arg0: i32, %arg1: i32) -> (i32, i32) {
    %c0_i32 = arith.constant 0 : i32
    %c0_i32_0 = arith.constant 0 : i32
    %c0_i32_1 = arith.constant 0 : i32
    return %c0_i32, %c0_i32_0 : i32, i32
  }
  func.func @transform_3(%arg0: i32, %arg1: i32) -> (i32, i32) {
    %c0_i32 = arith.constant 0 : i32
    %c0_i32_0 = arith.constant 0 : i32
    %c0_i32_1 = arith.constant 0 : i32
    return %c0_i32, %c0_i32_0 : i32, i32
  }
  func.func @transform_4(%arg0: i32, %arg1: i32) -> (i32, i32) {
    %c0_i32 = arith.constant 0 : i32
    %c0_i32_0 = arith.constant 0 : i32
    return %arg0, %c0_i32 : i32, i32
  }
}

</mosaic_0001>

<bundles_post_ra>
// kernel: tpu_custom_call.1
= control target key start
LH: loop header
LB: loop body
LE: loop exit
PB: predicated region body
PF: predicated region fallthrough
CT: control target
= control target key end

     0   :  { %9 = vsyncpa [#allocation4], 0  ;;  %s1772_s0 = inlined_call_operand.vmem [shape: bf16[512,16], index: 0, kind: input, shape index: {}]   ;;  %s1773_s1 = inlined_call_operand.vmem [shape: bf16[16,128], index: 1, kind: input, shape index: {}]   ;;  %s1774_s2 = inlined_call_operand.vmem [shape: f32[1,128], index: 2, kind: input, shape index: {}]   ;;  %s1775_s3 = inlined_call_operand.vmem [shape: f32[1,128], index: 3, kind: input, shape index: {}]   ;;  %s1776_s4 = inlined_call_operand.hbm [shape: bf16[512,128], index: 4, kind: output, shape index: {}]  }
   0x1   :  { %11 = vsyncpa [#allocation4 + $0x1], 0  ;;  %s1525_s15 = smov 0   ;;  %s1527_s16 = smov 0  }
   0x2   :  { %s1529_s17 = smov 0   ;;  %s1531_s18 = smov 0  }
   0x3   :  { %s1533_s19 = smov 0   ;;  %s1535_s20 = smov 0  }
   0x4 LB: > { %s1084_s21 = sadd.s32 4294967295, %s1495_s20   ;;  %s1085_s22 = sadd.s32 4294967294, %s1495_s20   ;;  %s1495_s20 = sphi %s1535_s20, %s17_s20   ;;  %s1491_s19 = sphi %s1533_s19, %s1783_s19   ;;  %s1487_s18 = sphi %s1531_s18, %s1782_s18   ;;  %s1483_s17 = sphi %s1529_s17, %s1781_s17   ;;  %s1479_s16 = sphi %s1527_s16, %s1780_s16   ;;  %s1475_s15 = sphi %s1525_s15, %s1779_s15  }
   0x5   : > { %s29_s23 = sadd.s32 1, %s1491_s19  ;;  %s127_s24 = sadd.s32 1, %s1483_s17 }
   0x6   : > { %p31_p0 = scmp.ge.s32.totalorder %s29_s23, 2  ;;  %p137_p1 = scmp.ne.s32.totalorder %s1483_s17, %s1479_s16 }
   0x7   : > { %p138_p2 = scmp.eq.s32.totalorder %s1084_s21, 1  ;;  %p143_p3 = scmp.ne.s32.totalorder %s1479_s16, %s1475_s15 }
   0x8   : > { %s1785_s23 = smov (%p31_p0, %s29_s23), 0  ;;  %p144_p5 = scmp.eq.s32.totalorder %s1085_s22, 1 }
   0x9   : > { %p1565_p4 = por %p138_p2, %p137_p1  ;;  %s124_s26 = ssub.s32 %s1491_s19, %s1785_s23 }
   0xa   : > { %p1088_p6 = scmp.ge.s32.totalorder %s1495_s20, 1  ;;  %p125_p7 = scmp.eq.s32.totalorder %s124_s26, 0 }
   0xb   : > { %p1572_p8 = por %p144_p5, %p143_p3  ;;  %p183_p9 = scmp.lt.s32.totalorder %s1495_s20, 3 }
   0xc   : > { %s1578_s28 = scalar_select %p125_p7, %s1483_s17, %s127_s24  }
   0xd   : > { %p184_p10 = pnand %p1088_p6, %p183_p9 }
   0xe   : > { %s1090_s5 = sshll.u32 (!%p184_p10), %s1487_s18, 5  ;;  %s209_s14 = sand.u32 (!%p184_p10), 1, %s1479_s16  }
   0xf   : > { %187 = sbr.rel (%p184_p10) target bundleno = 271 (0x10f), region = 36  ;;  %p213_p11 = scmp.lt.s32.totalorder (!%p184_p10), %s1090_s5, 63 }
  0x10   : > { %s1089_s21 = sshll.u32 (!%p184_p10), %s209_s14, 7  ;;  %s1196_s24 = sshll.u32 (!%p184_p10), %s1487_s18, 11 }
  0x11   : > { %s1654_s22 = scalar_lea.vmem (!%p184_p10), [#allocation3], %s1089_s21  ;;  %s1727_s18 = scalar_lea.sflag (!%p184_p10), [#allocation4], %s209_s14 }
  0x12   : > { %s1009_s26 = sshll.u32 (!%p184_p10), %s1654_s22, 4  ;;  %s1497_s7 = smov (!%p184_p10), [#allocation3]   ;;  %s1720_s26 = int_to_ptr.vmem [resolvable:$true] %s1009_s26 }
  0x13   : > { %s1423_s8 = sshll.u32 (!%p184_p10), %s1497_s7, 4  ;;  %s1424_s8 = int_to_ptr.vmem [resolvable:$false] %s1423_s8 }
  0x14   : > { %v1402_v0 = vld [vmem:[%s1773_s1] sm:$0xff]   ;;  %s1787_s5 = smov (!%p213_p11, %s1090_s5), 63  ;;  %vm416_vm0 = vcmask 130048   ;;  %p1426_p1 = scmp.lt.s32.totalorder %s1720_s26, %s1424_s8 }
  0x15   : > { %1309 = vmatprep.subr.bf16.mxu0 %v1402_v0  ;;  %1343 = vmatprep.subr.bf16.mxu1 %v1402_v0  ;;  %s1091_s6 = sshll.u32 %s1787_s5, 2  ;;  %v1624_v17 = vld [vmem:[%s1774_s2] ss:$0 sm:$0xff]  ;;  %s1718_s5 = scalar_lea.hbm %s1776_s4, %s1196_s24 }
  0x16   : > { %1310 = vmatpush3.bf16.msra.mxu0 %v1402_v0  ;;  %1344 = vmatpush3.bf16.msra.mxu1 %v1402_v0  ;;  %s1587_s9 = scalar_lea.vmem %s1772_s0, %s1091_s6  ;;  %v1630_v21 = vld [vmem:[%s1775_s3] ss:$0 sm:$0xff]  ;;  %s1419_s6 = scalar_lea.vmem %s1720_s26, 2048 }
  0x17   : > { %v1403_v1 = vld [vmem:[%s1587_s9] sm:$0xff]   ;;  %v1405_v3 = vld [vmem:[%s1587_s9 + $0x8] sm:$0xff]   ;;  %v1407_v5 = vld [vmem:[%s1587_s9 + $0x10] sm:$0xff]   ;;  %p1420_p12 = scmp.ne.s32.totalorder %s1720_s26, %s1419_s6 }
  0x18   : > { %v1404_v2 = vld [vmem:[%s1587_s9 + $0x40] sm:$0xff]   ;;  %1311 = vmatprep.mubr.msk.bf16.mxu0 %vm416_vm0, %v1403_v1  ;;  %v1406_v4 = vld [vmem:[%s1587_s9 + $0x48] sm:$0xff]   ;;  %v1408_v6 = vld [vmem:[%s1587_s9 + $0x50] sm:$0xff]  }
  0x19   : > { %1327 = vmatprep.mubr.msk.bf16.mxu1 %vm416_vm0, %v1404_v2  ;;  %1312 = vmatmul.mubr.msk.bf16.vlgmr.msra.gmra.mxu0 %vm416_vm0, %v1405_v3  ;;  %v1409_v7 = vld [vmem:[%s1587_s9 + $0x18] sm:$0xff]   ;;  %v1411_v9 = vld [vmem:[%s1587_s9 + $0x20] sm:$0xff]   ;;  %v1413_v11 = vld [vmem:[%s1587_s9 + $0x28] sm:$0xff]   ;;  %p1421_p13 = pnand %p1420_p12, %p1565_p4 }
  0x1a   : > { %1328 = vmatmul.mubr.msk.bf16.vlgmr.msra.gmra.mxu1 %vm416_vm0, %v1406_v4  ;;  %1315 = vmatprep.mubr.msk.bf16.mxu0 %vm416_vm0, %v1407_v5  ;;  %v1410_v8 = vld [vmem:[%s1587_s9 + $0x58] sm:$0xff]   ;;  %v1412_v10 = vld [vmem:[%s1587_s9 + $0x60] sm:$0xff]   ;;  %v1414_v12 = vld [vmem:[%s1587_s9 + $0x68] sm:$0xff]  }
  0x1b   : > { %1331 = vmatprep.mubr.msk.bf16.mxu1 %vm416_vm0, %v1408_v6  ;;  %v1415_v13 = vld [vmem:[%s1587_s9 + $0x30] sm:$0xff]   ;;  %v1417_v15 = vld [vmem:[%s1587_s9 + $0x38] sm:$0xff]   ;;  %p1422_p0 = pneg %p1421_p13 }
  0x1c   : > { %v1416_v14 = vld [vmem:[%s1587_s9 + $0x70] sm:$0xff]   ;;  %v1418_v16 = vld [vmem:[%s1587_s9 + $0x78] sm:$0xff]   ;;  %s1425_s9 = scalar_lea.vmem %s1424_s8, 4096 }
  0x1d   : > { %p1427_p2 = scmp.lt.s32.totalorder %s1425_s9, %s1419_s6 }
  0x1f   : > { %p1428_p3 = por %p1427_p2, %p1426_p1 }
  0x21   : > { %1316 = vmatmul.mubr.msk.bf16.gmra.mxu0 %vm416_vm0, %v1409_v7  ;;  %p1429_p5 = pnand %p1428_p3, %p1422_p0 }
  0x22   : > { %1332 = vmatmul.mubr.msk.bf16.gmra.mxu1 %vm416_vm0, %v1410_v8  ;;  %1319 = vmatprep.mubr.msk.bf16.mxu0 %vm416_vm0, %v1411_v9 }
  0x23   : > { %1335 = vmatprep.mubr.msk.bf16.mxu1 %vm416_vm0, %v1412_v10 }
  0x29   : > { %1320 = vmatmul.mubr.msk.bf16.gmra.mxu0 %vm416_vm0, %v1413_v11 }
  0x2a   : > { %1336 = vmatmul.mubr.msk.bf16.gmra.mxu1 %vm416_vm0, %v1414_v12  ;;  %1323 = vmatprep.mubr.msk.bf16.mxu0 %vm416_vm0, %v1415_v13 }
  0x2b   : > { %1339 = vmatprep.mubr.msk.bf16.mxu1 %vm416_vm0, %v1416_v14 }
  0x31   : > { %1324 = vmatmul.mubr.msk.bf16.gmra.mxu0 %vm416_vm0, %v1417_v15 }
  0x32   : > { %1340 = vmatmul.mubr.msk.bf16.gmra.mxu1 %vm416_vm0, %v1418_v16 }
  0xd9   : > { %v1313_v18 = vpop.f32.mrf.mxu0 }
  0xda   : > { %v734_v19 = vmul.f32 %v1313_v18, %v1624_v17  ;;  %v1329_v20 = vpop.f32.mrf.mxu1 }
  0xdb   : > { %v750_v22 = vmul.f32 %v1329_v20, %v1624_v17  ;;  %v499_v23 = vpop.f32.mrf.mxu0 }
  0xdc   : > { %v732_v24 = vmul.f32 %v1624_v17, %v499_v23  ;;  %v563_v25 = vpop.f32.mrf.mxu1  ;;  %v773_v28 = vadd.f32 %v1630_v21, %v734_v19 }
  0xdd   : > { %v748_v26 = vmul.f32 %v1624_v17, %v563_v25  ;;  %v1314_v27 = vpop.f32.mrf.mxu0  ;;  %v789_v31 = vadd.f32 %v1630_v21, %v750_v22 }
  0xde   : > { %v735_v29 = vmul.f32 %v1314_v27, %v1624_v17  ;;  %v1330_v30 = vpop.f32.mrf.mxu1  ;;  %v771_v34 = vadd.f32 %v1630_v21, %v732_v24  ;;  %v805_v42 = vmax.f32 %v773_v28, 0.0 }
  0xdf   : > { %v751_v32 = vmul.f32 %v1330_v30, %v1624_v17  ;;  %v502_v33 = vpop.f32.mrf.mxu0  ;;  %v787_v38 = vadd.f32 %v1630_v21, %v748_v26  ;;  %v821_v47 = vmax.f32 %v789_v31, 0.0 }
  0xe0   : > { %v774_v35 = vadd.f32 %v1630_v21, %v735_v29  ;;  %v733_v36 = vmul.f32 %v1624_v17, %v502_v33  ;;  %v566_v37 = vpop.f32.mrf.mxu1  ;;  %v803_v52 = vmax.f32 %v771_v34, 0.0 }
  0xe1   : > { %v790_v39 = vadd.f32 %v1630_v21, %v751_v32  ;;  %v749_v40 = vmul.f32 %v1624_v17, %v566_v37  ;;  %v1317_v41 = vpop.f32.mrf.mxu0  ;;  %v819_v57 = vmax.f32 %v787_v38, 0.0 }
  0xe2   : > { %v806_v43 = vmax.f32 %v774_v35, 0.0  ;;  %v772_v44 = vadd.f32 %v1630_v21, %v733_v36  ;;  %v738_v45 = vmul.f32 %v1317_v41, %v1624_v17  ;;  %v1333_v46 = vpop.f32.mrf.mxu1 }
  0xe3   : > { %v822_v48 = vmax.f32 %v790_v39, 0.0  ;;  %v788_v49 = vadd.f32 %v1630_v21, %v749_v40  ;;  %v754_v50 = vmul.f32 %v1333_v46, %v1624_v17  ;;  %v515_v51 = vpop.f32.mrf.mxu0 }
  0xe4   : > { %v1205_v53 = vpack.c.bf16 %v806_v43, %v805_v42  ;;  %v804_v54 = vmax.f32 %v772_v44, 0.0  ;;  %v736_v55 = vmul.f32 %v1624_v17, %v515_v51  ;;  %v579_v56 = vpop.f32.mrf.mxu1  ;;  %v777_v63 = vadd.f32 %v1630_v21, %v738_v45 }
  0xe5   : > { %v1245_v58 = vpack.c.bf16 %v822_v48, %v821_v47  ;;  %v820_v59 = vmax.f32 %v788_v49, 0.0  ;;  %v752_v60 = vmul.f32 %v1624_v17, %v579_v56  ;;  %v1318_v61 = vpop.f32.mrf.mxu0  ;;  %v793_v3 = vadd.f32 %v1630_v21, %v754_v50 }
  0xe6   : > { %1277 = vst [vmem:[%s1654_s22 + $0x8] sm:$0xff] %v1205_v53   ;;  %v1200_v62 = vpack.c.bf16 %v804_v54, %v803_v52  ;;  %v739_v0 = vmul.f32 %v1318_v61, %v1624_v17  ;;  %v1334_v1 = vpop.f32.mrf.mxu1  ;;  %v775_v6 = vadd.f32 %v1630_v21, %v736_v55  ;;  %v809_v14 = vmax.f32 %v777_v63, 0.0 }
  0xe7   : > { %1285 = vst [vmem:[%s1654_s22 + $0x48] sm:$0xff] %v1245_v58   ;;  %v1240_v2 = vpack.c.bf16 %v820_v59, %v819_v57  ;;  %v755_v4 = vmul.f32 %v1334_v1, %v1624_v17  ;;  %v518_v5 = vpop.f32.mrf.mxu0  ;;  %v791_v10 = vadd.f32 %v1630_v21, %v752_v60  ;;  %v825_v20 = vmax.f32 %v793_v3, 0.0 }
  0xe8   : > { %1201 = vst [vmem:[%s1654_s22] sm:$0xff] %v1200_v62   ;;  %v778_v7 = vadd.f32 %v1630_v21, %v739_v0  ;;  %v737_v8 = vmul.f32 %v1624_v17, %v518_v5  ;;  %v582_v9 = vpop.f32.mrf.mxu1  ;;  %v807_v26 = vmax.f32 %v775_v6, 0.0 }
  0xe9   : > { %1284 = vst [vmem:[%s1654_s22 + $0x40] sm:$0xff] %v1240_v2   ;;  %v794_v11 = vadd.f32 %v1630_v21, %v755_v4  ;;  %v753_v12 = vmul.f32 %v1624_v17, %v582_v9  ;;  %v1321_v13 = vpop.f32.mrf.mxu0  ;;  %v823_v31 = vmax.f32 %v791_v10, 0.0 }
  0xea   : > { %v810_v15 = vmax.f32 %v778_v7, 0.0  ;;  %v776_v16 = vadd.f32 %v1630_v21, %v737_v8  ;;  %v742_v18 = vmul.f32 %v1321_v13, %v1624_v17  ;;  %v1337_v19 = vpop.f32.mrf.mxu1 }
  0xeb   : > { %v826_v22 = vmax.f32 %v794_v11, 0.0  ;;  %v792_v23 = vadd.f32 %v1630_v21, %v753_v12  ;;  %v758_v24 = vmul.f32 %v1337_v19, %v1624_v17  ;;  %v531_v25 = vpop.f32.mrf.mxu0 }
  0xec   : > { %v1215_v27 = vpack.c.bf16 %v810_v15, %v809_v14  ;;  %v808_v28 = vmax.f32 %v776_v16, 0.0  ;;  %v740_v29 = vmul.f32 %v1624_v17, %v531_v25  ;;  %v595_v30 = vpop.f32.mrf.mxu1  ;;  %v781_v37 = vadd.f32 %v1630_v21, %v742_v18 }
  0xed   : > { %v1255_v32 = vpack.c.bf16 %v826_v22, %v825_v20  ;;  %v824_v33 = vmax.f32 %v792_v23, 0.0  ;;  %v756_v34 = vmul.f32 %v1624_v17, %v595_v30  ;;  %v1322_v35 = vpop.f32.mrf.mxu0  ;;  %v797_v41 = vadd.f32 %v1630_v21, %v758_v24 }
  0xee   : > { %1279 = vst [vmem:[%s1654_s22 + $0x18] sm:$0xff] %v1215_v27   ;;  %v1210_v36 = vpack.c.bf16 %v808_v28, %v807_v26  ;;  %v743_v38 = vmul.f32 %v1322_v35, %v1624_v17  ;;  %v1338_v39 = vpop.f32.mrf.mxu1  ;;  %v779_v44 = vadd.f32 %v1630_v21, %v740_v29  ;;  %v813_v52 = vmax.f32 %v781_v37, 0.0 }
  0xef   : > { %1287 = vst [vmem:[%s1654_s22 + $0x58] sm:$0xff] %v1255_v32   ;;  %v1250_v40 = vpack.c.bf16 %v824_v33, %v823_v31  ;;  %v759_v42 = vmul.f32 %v1338_v39, %v1624_v17  ;;  %v534_v43 = vpop.f32.mrf.mxu0  ;;  %v795_v48 = vadd.f32 %v1630_v21, %v756_v34  ;;  %v829_v57 = vmax.f32 %v797_v41, 0.0 }
  0xf0   : > { %1278 = vst [vmem:[%s1654_s22 + $0x10] sm:$0xff] %v1210_v36   ;;  %v782_v45 = vadd.f32 %v1630_v21, %v743_v38  ;;  %v741_v46 = vmul.f32 %v1624_v17, %v534_v43  ;;  %v598_v47 = vpop.f32.mrf.mxu1  ;;  %v811_v62 = vmax.f32 %v779_v44, 0.0 }
  0xf1   : > { %1286 = vst [vmem:[%s1654_s22 + $0x50] sm:$0xff] %v1250_v40   ;;  %v798_v49 = vadd.f32 %v1630_v21, %v759_v42  ;;  %v757_v50 = vmul.f32 %v1624_v17, %v598_v47  ;;  %v1325_v51 = vpop.f32.mrf.mxu0  ;;  %v827_v3 = vmax.f32 %v795_v48, 0.0 }
  0xf2   : > { %v814_v53 = vmax.f32 %v782_v45, 0.0  ;;  %v780_v54 = vadd.f32 %v1630_v21, %v741_v46  ;;  %v746_v55 = vmul.f32 %v1325_v51, %v1624_v17  ;;  %v1341_v56 = vpop.f32.mrf.mxu1 }
  0xf3   : > { %v830_v58 = vmax.f32 %v798_v49, 0.0  ;;  %v796_v59 = vadd.f32 %v1630_v21, %v757_v50  ;;  %v762_v60 = vmul.f32 %v1341_v56, %v1624_v17  ;;  %v547_v61 = vpop.f32.mrf.mxu0 }
  0xf4   : > { %v1225_v63 = vpack.c.bf16 %v814_v53, %v813_v52  ;;  %v812_v0 = vmax.f32 %v780_v54, 0.0  ;;  %v744_v1 = vmul.f32 %v1624_v17, %v547_v61  ;;  %v611_v2 = vpop.f32.mrf.mxu1  ;;  %v785_v9 = vadd.f32 %v1630_v21, %v746_v55 }
  0xf5   : > { %v1265_v4 = vpack.c.bf16 %v830_v58, %v829_v57  ;;  %v828_v5 = vmax.f32 %v796_v59, 0.0  ;;  %v760_v6 = vmul.f32 %v1624_v17, %v611_v2  ;;  %v1326_v7 = vpop.f32.mrf.mxu0  ;;  %v801_v13 = vadd.f32 %v1630_v21, %v762_v60 }
  0xf6   : > { %1281 = vst [vmem:[%s1654_s22 + $0x28] sm:$0xff] %v1225_v63   ;;  %v1220_v8 = vpack.c.bf16 %v812_v0, %v811_v62  ;;  %v747_v10 = vmul.f32 %v1326_v7, %v1624_v17  ;;  %v1342_v11 = vpop.f32.mrf.mxu1  ;;  %v783_v16 = vadd.f32 %v1630_v21, %v744_v1  ;;  %v817_v25 = vmax.f32 %v785_v9, 0.0 }
  0xf7   : > { %1289 = vst [vmem:[%s1654_s22 + $0x68] sm:$0xff] %v1265_v4   ;;  %v1260_v12 = vpack.c.bf16 %v828_v5, %v827_v3  ;;  %v763_v14 = vmul.f32 %v1342_v11, %v1624_v17  ;;  %v550_v15 = vpop.f32.mrf.mxu0  ;;  %v799_v22 = vadd.f32 %v1630_v21, %v760_v6  ;;  %v833_v28 = vmax.f32 %v801_v13, 0.0 }
  0xf8   : > { %1280 = vst [vmem:[%s1654_s22 + $0x20] sm:$0xff] %v1220_v8   ;;  %v786_v18 = vadd.f32 %v1630_v21, %v747_v10  ;;  %v745_v19 = vmul.f32 %v1624_v17, %v550_v15  ;;  %v614_v20 = vpop.f32.mrf.mxu1  ;;  %v815_v31 = vmax.f32 %v783_v16, 0.0 }
  0xf9   : > { %1288 = vst [vmem:[%s1654_s22 + $0x60] sm:$0xff] %v1260_v12   ;;  %v802_v23 = vadd.f32 %v1630_v21, %v763_v14  ;;  %v761_v24 = vmul.f32 %v1624_v17, %v614_v20  ;;  %v831_v34 = vmax.f32 %v799_v22, 0.0 }
  0xfa   : > { %v818_v26 = vmax.f32 %v786_v18, 0.0  ;;  %v784_v27 = vadd.f32 %v1630_v21, %v745_v19 }
  0xfb   : > { %v834_v29 = vmax.f32 %v802_v23, 0.0  ;;  %v800_v30 = vadd.f32 %v1630_v21, %v761_v24 }
  0xfc   : > { %v1235_v32 = vpack.c.bf16 %v818_v26, %v817_v25  ;;  %v816_v33 = vmax.f32 %v784_v27, 0.0 }
  0xfd   : > { %v1275_v17 = vpack.c.bf16 %v834_v29, %v833_v28  ;;  %v832_v35 = vmax.f32 %v800_v30, 0.0 }
  0xfe   : > { %1283 = vst [vmem:[%s1654_s22 + $0x38] sm:$0xff] %v1235_v32   ;;  %v1230_v36 = vpack.c.bf16 %v816_v33, %v815_v31 }
  0xff   : > { %1291 = vst [vmem:[%s1654_s22 + $0x78] sm:$0xff] %v1275_v17   ;;  %v1270_v21 = vpack.c.bf16 %v832_v35, %v831_v34 }
 0x100   : > { %1282 = vst [vmem:[%s1654_s22 + $0x30] sm:$0xff] %v1230_v36  }
 0x101   : > { %1290 = vst [vmem:[%s1654_s22 + $0x70] sm:$0xff] %v1270_v21  }
 0x102   : > { %1432 = shalt.err (!%p1429_p5)
}
 0x103   : > { %s1433_s10 = scalar_lea.hbm %s1718_s5, 2048  ;;  %s1437_s13 = scalar_lea.hbm %s1776_s4, 4096 }
 0x104   : > { %p1434_p6 = scmp.ne.s32.totalorder %s1718_s5, %s1433_s10  ;;  %p1438_p10 = scmp.lt.s32.totalorder %s1718_s5, %s1776_s4 }
 0x105   : > { %p1439_p11 = scmp.lt.s32.totalorder %s1437_s13, %s1433_s10 }
 0x106   : > { %p1435_p7 = pnand %p1434_p6, %p1565_p4 }
 0x107   : > { %p1440_p12 = por %p1439_p11, %p1438_p10 }
 0x108   : > { %p1436_p9 = pneg %p1435_p7 }
 0x10a   : > { %p1441_p13 = pnand %p1440_p12, %p1436_p9 }
 0x10c   : > { %1444 = shalt.err (!%p1441_p13)
}
 0x10d   : > { %s1498_s22 = smov 64   ;;  %s1499_s24 = smov 4  }
 0x10e   : > { %1345 = dma.vmem_to_hbm [thread:$0]  (%p1565_p4), %s1720_s26, 2048, %s1718_s5, %s1727_s18, %s1498_s22, %s1498_s22, %s1499_s24  }
 0x10f PF: > { %p1351_p0 = scmp.ge.s32.totalorder %s1495_s20, 2  ;;  %s1024_s29 = sand.u32 1, %s1475_s15  }
 0x110   : > { %s1025_s30 = scalar_lea.sflag [#allocation4], %s1024_s29 }
 0x111   : > { %p1348_p1 = pnand %p1351_p0, %p1572_p8 }
 0x113   : > { %p1349_p2 = pneg %p1348_p1 }
 0x115   : > { %1470 = dma.done.wait (%p1349_p2), %s1025_s30, 2048  }
 0x116   : > { %1472 = vsyncadd (%p1349_p2), %s1025_s30, 4294965248  ;;  %s17_s20 = sadd.s32 1, %s1495_s20   ;;  %s1779_s15 = smov %s1479_s16 }
 0x117   : > { %p14_p3 = scmp.ge.s32.totalorder %s17_s20, 4   ;;  %s1780_s16 = smov %s1483_s17 }
 0x118   : > { %s1781_s17 = smov %s1578_s28  ;;  %s1782_s18 = smov %s1491_s19 }
 0x119   : > { %s1783_s19 = smov %s1785_s23  ;;  %16 = sbr.rel (!%p14_p3) target bundleno = 4 (0x4), region = 80 }
 0x11e   :  { %1030 = vsyncpa [#allocation4], 1 }
 0x11f   :  { %1032 = vsyncpa [#allocation4 + $0x1], 1 }

</bundles_post_ra>
